<compile_context>
chip_gen: v7x
topology: tpu7x:2x2x1
jax: 0.10.0
libtpu: 0.0.40
codegen_flags: <defaults>
</compile_context>

<pallas_src>
import math
import functools

import jax
import jax.numpy as jnp
from jax.experimental import pallas as pl
from jax.experimental.pallas import tpu as pltpu


def _physical_vmem_bytes():
    """Per-core physical VMEM, with a conservative fallback (v7x = 64 MiB)."""
    try:
        info = pltpu.get_tpu_info()
        for name in ("vmem_capacity_bytes", "vmem_size_bytes", "vmem_bytes"):
            v = getattr(info, name, None)
            if v:
                return int(v)
    except Exception:
        pass
    return 64 * 1024 * 1024


_PHYS_VMEM = _physical_vmem_bytes()
# ~75% of physical: 96 MiB on v5e/v6e (128 MiB phys), 48 MiB on v7x (64 MiB).
_VMEM_LIMIT = int(_PHYS_VMEM * 3 // 4)


# ----------------------------- QKV linear kernel -----------------------------
def _qkv_kernel(x_ref, w_ref, o_ref, *, mxu_dtype):
    # x_ref: (C, T) channels-major slab of the NCHW input;  w_ref: (C, 3C)
    # o_ref: (T, 3C) == rows of the NHWC-flattened linear output.
    # Contract the channel dim directly (transposed-LHS matmul on the MXU):
    # no NCHW->NHWC transpose pass is ever materialized in HBM.
    x = x_ref[...]
    w = w_ref[...]
    if mxu_dtype is not None:
        x = x.astype(mxu_dtype)
        w = w.astype(mxu_dtype)
    o_ref[...] = jax.lax.dot_general(
        x, w,
        dimension_numbers=(((0,), (0,)), ((), ())),
        preferred_element_type=jnp.float32,
    ).astype(o_ref.dtype)


def _row_tile(hw, c_in, c_out, itemsize, vmem_limit):
    """H*W row tile: as large as the per-step VMEM budget allows (lane multiple)."""
    if hw <= 128:
        return hw
    # Budget for one pipelined step (x tile + out tile, double buffered), minus
    # the resident (double-buffered) weight block.
    budget = max(vmem_limit // 3 - 2 * c_in * c_out * itemsize, 1 << 20)
    per_row = itemsize * (c_in + c_out)
    t = (budget // (2 * per_row)) // 128 * 128
    t = max(128, t)
    if t >= hw:
        return hw
    return t


def _tile_span(row_start, row_end, t, hw):
    lo = row_start // t
    hi = min(pl.cdiv(hw, t), pl.cdiv(row_end, t))
    return lo, hi


def qkv_linear_nchw(x, w_t, *, row_start=0, row_end=None, mxu_dtype=None):
    """x: (B, C, H, W) NCHW, w_t: (C, 3C).  Returns (B, H*W, 3C) whose row-major
    layout equals the PyTorch (B, H, W, 3C) linear output.  Only the rows in
    [row_start, row_end), rounded outward to tile boundaries, are computed; the
    remaining rows of the output are left unwritten (and are never read)."""
    B, C, H, W = x.shape
    c3 = w_t.shape[1]
    hw = H * W
    if row_end is None:
        row_end = hw
    x_r = x.reshape(B, C, hw)               # contiguous minor-dim merge: free

    t = _row_tile(hw, C, c3, x.dtype.itemsize, _VMEM_LIMIT)
    lo, hi = _tile_span(row_start, row_end, t, hw)
    # Keep v7x's two TensorCores subscribed: aim for >= 4 parallel grid steps.
    while B * (hi - lo) < 4 and t > 128:
        t = max(128, (t // 2) // 128 * 128)
        lo, hi = _tile_span(row_start, row_end, t, hw)
    ntiles = hi - lo
    rows = min(hi * t, hw) - lo * t

    cost = pl.CostEstimate(
        flops=2 * B * rows * C * c3,
        transcendentals=0,
        bytes_accessed=(B * C * rows + C * c3 + B * rows * c3) * x.dtype.itemsize,
    )
    # TODO(synk): the weight block is constant across the grid; single-buffering
    # it (pipeline_mode=pl.Buffered(1)) would free C*3C*itemsize of VMEM for a
    # bigger row tile once that mode is verified on the target jax version.
    return pl.pallas_call(
        functools.partial(_qkv_kernel, mxu_dtype=mxu_dtype),
        out_shape=jax.ShapeDtypeStruct((B, hw, c3), x.dtype),
        grid_spec=pltpu.PrefetchScalarGridSpec(
            num_scalar_prefetch=0,
            grid=(B, ntiles),
            in_specs=[
                pl.BlockSpec((None, C, t), lambda b, i: (b, 0, i + lo)),
                pl.BlockSpec((C, c3), lambda b, i: (0, 0)),     # weight resident
            ],
            out_specs=pl.BlockSpec((None, t, c3), lambda b, i: (b, i + lo, 0)),
        ),
        compiler_params=pltpu.CompilerParams(
            dimension_semantics=("parallel", "parallel"),
            vmem_limit_bytes=_VMEM_LIMIT,
        ),
        cost_estimate=cost,
    )(x_r, w_t)


# --------------------------- cross-attention kernel ---------------------------
def _attn_kernel(q_ref, k_ref, v_ref, o_ref, *, scale, mxu_dtype):
    # q_ref: (G, H2, W); k_ref/v_ref: (G, H1, W); o_ref: (G, H2, W)
    q = q_ref[...]
    k = k_ref[...]
    v = v_ref[...]
    if mxu_dtype is not None:
        q = q.astype(mxu_dtype)
        k = k.astype(mxu_dtype)
        v = v.astype(mxu_dtype)
    q = q * scale                   # fold scale into q (H2xW), not scores (H2xH1)
    # scores[g, i, j] = sum_w q[g, i, w] * k[g, j, w]   (batched q @ k^T)
    s = jax.lax.dot_general(
        q, k, dimension_numbers=(((2,), (2,)), ((0,), (0,))),
        preferred_element_type=jnp.float32)                    # (G, H2, H1) f32
    s = s - jnp.max(s, axis=-1, keepdims=True)
    p = jnp.exp(s)                                             # unnormalized
    l = jnp.sum(p, axis=-1, keepdims=True)                     # (G, H2, 1) f32
    # attn_drop / proj_drop are nn.Dropout(0.0) -> identity.
    o = jax.lax.dot_general(
        p.astype(v.dtype), v, dimension_numbers=(((2,), (1,)), ((0,), (0,))),
        preferred_element_type=jnp.float32)                    # (G, H2, W) f32
    # Normalize AFTER the PV matmul: one reciprocal multiply over the small
    # (G, H2, W) output instead of the (G, H2, H1) probability tensor.
    o_ref[...] = (o * pl.reciprocal(l, approx=True)).astype(o_ref.dtype)


def _group_size(b, c, h1, h2, w, itemsize, vmem_limit):
    """# of (b, c) slabs batched per grid step (amortize ~0.35us/step) while the
    double-buffered DMA tiles plus f32 intermediates still fit in VMEM."""
    dma = 2 * itemsize * (2 * h2 * w + 2 * h1 * w)    # q+out and k+v, x2 buffers
    f32_tmp = 4 * (2 * h2 * h1 + h2 * w)              # scores, probs, f32 PV acc
    per_slab = dma + f32_tmp
    budget = max(vmem_limit // 2 - (2 << 20), per_slab)   # headroom for scratch
    g = int(max(1, min(c, budget // per_slab)))
    # Keep v7x's two TensorCores subscribed: aim for >= 4 parallel grid steps.
    min_c_tiles = -(-4 // max(b, 1))
    if c >= min_c_tiles:
        g = min(g, max(1, c // min_c_tiles))
    while c % g:                                       # keep the C grid exact
        g -= 1
    return g


def cross_attention(qkv_q, qkv_kv, scale, *, mxu_dtype=None):
    """qkv_q: (B, 3, C, H2, W); qkv_kv: (B, 3, C, H1, W).
    q is read from qkv_q[:, 0], k / v from qkv_kv[:, 1] / [:, 2] directly via
    index_map (no slice materialization).  Returns (B, C, H2, W)."""
    B, _, C, H2, W = qkv_q.shape
    H1 = qkv_kv.shape[3]
    g = _group_size(B, C, H1, H2, W, qkv_q.dtype.itemsize, _VMEM_LIMIT)
    grid = (B, C // g)

    cost = pl.CostEstimate(
        flops=4 * B * C * H2 * H1 * W,
        transcendentals=B * C * H2 * (H1 + 1),          # exp + reciprocal
        bytes_accessed=B * C * (2 * H2 * W + 2 * H1 * W) * qkv_q.dtype.itemsize,
    )
    # NOTE: W < 128 -> lane-masked output stores; keep W a multiple of 128 for
    # production shapes (lane-dense out_spec is the biggest single lever).
    return pl.pallas_call(
        functools.partial(_attn_kernel, scale=scale, mxu_dtype=mxu_dtype),
        out_shape=jax.ShapeDtypeStruct((B, C, H2, W), qkv_q.dtype),
        grid_spec=pltpu.PrefetchScalarGridSpec(
            num_scalar_prefetch=0,
            grid=grid,
            in_specs=[
                pl.BlockSpec((None, None, g, H2, W), lambda b, i: (b, 0, i, 0, 0)),
                pl.BlockSpec((None, None, g, H1, W), lambda b, i: (b, 1, i, 0, 0)),
                pl.BlockSpec((None, None, g, H1, W), lambda b, i: (b, 2, i, 0, 0)),
            ],
            out_specs=pl.BlockSpec((None, g, H2, W), lambda b, i: (b, i, 0, 0)),
        ),
        compiler_params=pltpu.CompilerParams(
            dimension_semantics=("parallel", "parallel"),
            vmem_limit_bytes=_VMEM_LIMIT,
        ),
        cost_estimate=cost,
    )(qkv_q, qkv_kv, qkv_kv)


# --------------------------------- forward -----------------------------------
def cross_attention_mp_forward(x, y, w_qkv, scale=1.0 / math.sqrt(64),
                               mxu_dtype=None):
    B1, C1, H1, W1 = x.shape
    B2, C2, H2, W2 = y.shape
    assert (B1, C1, W1) == (B2, C2, W2), "batched matmul needs matching B, C, W"

    w_t = jnp.transpose(w_qkv)              # (C, 3C); tiny one-time reorder
    hw1, hw2 = H1 * W1, H2 * W2

    # Only the rows that are read downstream are computed / written to HBM:
    #   qkv1 -> k, v live in flat elements [C*hw1, 3*C*hw1) -> rows [hw1//3, hw1)
    #   qkv2 -> q       lives in flat elements [0, C*hw2)   -> rows [0, ceil(hw2/3))
    # (the boundary row is computed whole on each side when hw % 3 != 0).
    qkv1 = qkv_linear_nchw(x, w_t, row_start=hw1 // 3, row_end=hw1,
                           mxu_dtype=mxu_dtype)            # (B, hw1, 3C) k/v rows
    qkv2 = qkv_linear_nchw(y, w_t, row_start=0, row_end=-(-hw2 // 3),
                           mxu_dtype=mxu_dtype)            # (B, hw2, 3C) q rows

    # Raw row-major reinterpretation — exactly PyTorch's .reshape(B,3,C,H,W)
    # of the (B, H, W, 3C) linear output (NOT a per-channel split).  Free.
    qkv1 = qkv1.reshape(B1, 3, C1, H1, W1)
    qkv2 = qkv2.reshape(B2, 3, C2, H2, W2)

    return cross_attention(qkv2, qkv1, scale, mxu_dtype=mxu_dtype)


# ------------------------------ pure-JAX reference ----------------------------
def ref_forward(x, y, w_qkv, scale=1.0 / math.sqrt(64)):
    B1, C1, H1, W1 = x.shape
    B2, C2, H2, W2 = y.shape
    x1 = jnp.transpose(x, (0, 2, 3, 1))
    qkv1 = (x1 @ w_qkv.T).reshape(B1, 3, C1, H1, W1)
    k1, v1 = qkv1[:, 1], qkv1[:, 2]
    y1 = jnp.transpose(y, (0, 2, 3, 1))
    qkv2 = (y1 @ w_qkv.T).reshape(B2, 3, C2, H2, W2)
    q2 = qkv2[:, 0]
    attn = jnp.einsum("bchw,bckw->bchk", q2, k1) * scale
    attn = jax.nn.softmax(attn, axis=-1)
    return jnp.einsum("bchk,bckw->bchw", attn, v1)


if __name__ == "__main__":
    key = jax.random.PRNGKey(0)
    kx, ky, kw = jax.random.split(key, 3)

    B, C = 2, 8            # dim == C (Linear in_features must equal channels)
    H1, W1 = 16, 16        # x spatial
    H2, W2 = 8, 16         # y spatial (W2 must equal W1: matmul inner dim)

    x = jax.random.normal(kx, (B, C, H1, W1), jnp.float32)
    y = jax.random.normal(ky, (B, C, H2, W2), jnp.float32)
    # qkv weight: nn.Linear(dim, 3*dim, bias=False) -> (3*dim, dim)
    w_qkv = jax.random.normal(kw, (3 * C, C), jnp.float32) * (1.0 / math.sqrt(C))

    fwd = jax.jit(cross_attention_mp_forward)
    out = jax.block_until_ready(fwd(x, y, w_qkv))

    ref = ref_forward(x, y, w_qkv)
    assert out.shape == (B, C, H2, W1), out.shape
    # approx reciprocal (EUP) in the softmax -> slightly looser tolerance.
    assert jnp.allclose(out, ref, atol=2e-3, rtol=2e-3), "mismatch vs reference"

    print("KERNEL_OK")
</pallas_src>

<mosaic_0001>
module attributes {stable_mosaic.version = 11 : i64} {
  func.func @_qkv_kernel(%arg0: i32, %arg1: i32, %arg2: memref<1x8x128xf32, #tpu.memory_space<vmem>>, %arg3: memref<8x24xf32, #tpu.memory_space<vmem>>, %arg4: memref<1x128x24xf32, #tpu.memory_space<vmem>>) attributes {dimension_semantics = [#tpu.dimension_semantics<parallel>, #tpu.dimension_semantics<parallel>], iteration_bounds = array<i64: 2, 2>, scalar_prefetch = 0 : i64, scratch_operands = 0 : i64, tpu.core_type = #tpu.core_type<tc>, window_params = [{transform_indices = @transform_0, window_bounds = array<i64: 1, 8, 128>}, {pipeline_mode = #tpu.pipeline_mode<synchronous>, transform_indices = @transform_1, window_bounds = array<i64: 8, 24>}, {transform_indices = @transform_2, window_bounds = array<i64: 1, 128, 24>}]} {
    %c0 = arith.constant 0 : index
    %c0_0 = arith.constant 0 : index
    %c0_1 = arith.constant 0 : index
    %0 = vector.load %arg2[%c0, %c0_0, %c0_1] : memref<1x8x128xf32, #tpu.memory_space<vmem>>, vector<1x8x128xf32>
    %1 = vector.shape_cast %0 : vector<1x8x128xf32> to vector<8x128xf32>
    %c0_2 = arith.constant 0 : index
    %c0_3 = arith.constant 0 : index
    %2 = vector.load %arg3[%c0_2, %c0_3] : memref<8x24xf32, #tpu.memory_space<vmem>>, vector<8x24xf32>
    %cst = arith.constant dense<0.000000e+00> : vector<128x24xf32>
    %3 = tpu.matmul %1, %2, %cst {dimension_numbers = #tpu.dot_dimension_numbers<[0], [0], [1], [1], [0, 1, 1, 1], [], []>} : vector<8x128xf32>, vector<8x24xf32>, vector<128x24xf32> -> vector<128x24xf32>
    %c0_4 = arith.constant 0 : index
    %c0_5 = arith.constant 0 : index
    %c0_6 = arith.constant 0 : index
    %4 = vector.load %arg4[%c0_4, %c0_5, %c0_6] : memref<1x128x24xf32, #tpu.memory_space<vmem>>, vector<1x128x24xf32>
    %5 = vector.shape_cast %4 : vector<1x128x24xf32> to vector<128x24xf32>
    %6 = vector.shape_cast %3 : vector<128x24xf32> to vector<1x128x24xf32>
    tpu.vector_store %arg4[%c0_4, %c0_5, %c0_6], %6 {strides = array<i32>} : memref<1x128x24xf32, #tpu.memory_space<vmem>>, vector<1x128x24xf32>,
    return
  }
  func.func @transform_0(%arg0: i32, %arg1: i32) -> (i32, i32, i32) {
    %c0_i32 = arith.constant 0 : i32
    %0 = arith.addi %arg1, %c0_i32 : i32
    %c0_i32_0 = arith.constant 0 : i32
    %c0_i32_1 = arith.constant 0 : i32
    return %arg0, %c0_i32_0, %0 : i32, i32, i32
  }
  func.func @transform_1(%arg0: i32, %arg1: i32) -> (i32, i32) {
    %c0_i32 = arith.constant 0 : i32
    %c0_i32_0 = arith.constant 0 : i32
    %c0_i32_1 = arith.constant 0 : i32
    return %c0_i32, %c0_i32_0 : i32, i32
  }
  func.func @transform_2(%arg0: i32, %arg1: i32) -> (i32, i32, i32) {
    %c0_i32 = arith.constant 0 : i32
    %0 = arith.addi %arg1, %c0_i32 : i32
    %c0_i32_0 = arith.constant 0 : i32
    %c0_i32_1 = arith.constant 0 : i32
    return %arg0, %0, %c0_i32_0 : i32, i32, i32
  }
}

module attributes {stable_mosaic.version = 11 : i64} {
  func.func @_qkv_kernel(%arg0: i32, %arg1: i32, %arg2: memref<1x8x128xf32, #tpu.memory_space<vmem>>, %arg3: memref<8x24xf32, #tpu.memory_space<vmem>>, %arg4: memref<1x128x24xf32, #tpu.memory_space<vmem>>) attributes {dimension_semantics = [#tpu.dimension_semantics<parallel>, #tpu.dimension_semantics<parallel>], iteration_bounds = array<i64: 2, 1>, scalar_prefetch = 0 : i64, scratch_operands = 0 : i64, tpu.core_type = #tpu.core_type<tc>, window_params = [{transform_indices = @transform_0, window_bounds = array<i64: 1, 8, 128>}, {pipeline_mode = #tpu.pipeline_mode<synchronous>, transform_indices = @transform_1, window_bounds = array<i64: 8, 24>}, {transform_indices = @transform_2, window_bounds = array<i64: 1, 128, 24>}]} {
    %c0 = arith.constant 0 : index
    %c0_0 = arith.constant 0 : index
    %c0_1 = arith.constant 0 : index
    %0 = vector.load %arg2[%c0, %c0_0, %c0_1] : memref<1x8x128xf32, #tpu.memory_space<vmem>>, vector<1x8x128xf32>
    %1 = vector.shape_cast %0 : vector<1x8x128xf32> to vector<8x128xf32>
    %c0_2 = arith.constant 0 : index
    %c0_3 = arith.constant 0 : index
    %2 = vector.load %arg3[%c0_2, %c0_3] : memref<8x24xf32, #tpu.memory_space<vmem>>, vector<8x24xf32>
    %cst = arith.constant dense<0.000000e+00> : vector<128x24xf32>
    %3 = tpu.matmul %1, %2, %cst {dimension_numbers = #tpu.dot_dimension_numbers<[0], [0], [1], [1], [0, 1, 1, 1], [], []>} : vector<8x128xf32>, vector<8x24xf32>, vector<128x24xf32> -> vector<128x24xf32>
    %c0_4 = arith.constant 0 : index
    %c0_5 = arith.constant 0 : index
    %c0_6 = arith.constant 0 : index
    %4 = vector.load %arg4[%c0_4, %c0_5, %c0_6] : memref<1x128x24xf32, #tpu.memory_space<vmem>>, vector<1x128x24xf32>
    %5 = vector.shape_cast %4 : vector<1x128x24xf32> to vector<128x24xf32>
    %6 = vector.shape_cast %3 : vector<128x24xf32> to vector<1x128x24xf32>
    tpu.vector_store %arg4[%c0_4, %c0_5, %c0_6], %6 {strides = array<i32>} : memref<1x128x24xf32, #tpu.memory_space<vmem>>, vector<1x128x24xf32>,
    return
  }
  func.func @transform_0(%arg0: i32, %arg1: i32) -> (i32, i32, i32) {
    %c0_i32 = arith.constant 0 : i32
    %0 = arith.addi %arg1, %c0_i32 : i32
    %c0_i32_0 = arith.constant 0 : i32
    %c0_i32_1 = arith.constant 0 : i32
    return %arg0, %c0_i32_0, %0 : i32, i32, i32
  }
  func.func @transform_1(%arg0: i32, %arg1: i32) -> (i32, i32) {
    %c0_i32 = arith.constant 0 : i32
    %c0_i32_0 = arith.constant 0 : i32
    %c0_i32_1 = arith.constant 0 : i32
    return %c0_i32, %c0_i32_0 : i32, i32
  }
  func.func @transform_2(%arg0: i32, %arg1: i32) -> (i32, i32, i32) {
    %c0_i32 = arith.constant 0 : i32
    %0 = arith.addi %arg1, %c0_i32 : i32
    %c0_i32_0 = arith.constant 0 : i32
    %c0_i32_1 = arith.constant 0 : i32
    return %arg0, %0, %c0_i32_0 : i32, i32, i32
  }
}

module attributes {stable_mosaic.version = 11 : i64} {
  func.func @_attn_kernel(%arg0: i32, %arg1: i32, %arg2: memref<1x1x4x8x16xf32, #tpu.memory_space<vmem>>, %arg3: memref<1x1x4x16x16xf32, #tpu.memory_space<vmem>>, %arg4: memref<1x1x4x16x16xf32, #tpu.memory_space<vmem>>, %arg5: memref<1x4x8x16xf32, #tpu.memory_space<vmem>>) attributes {dimension_semantics = [#tpu.dimension_semantics<parallel>, #tpu.dimension_semantics<parallel>], iteration_bounds = array<i64: 2, 2>, scalar_prefetch = 0 : i64, scratch_operands = 0 : i64, tpu.core_type = #tpu.core_type<tc>, window_params = [{transform_indices = @transform_0, window_bounds = array<i64: 1, 1, 4, 8, 16>}, {transform_indices = @transform_1, window_bounds = array<i64: 1, 1, 4, 16, 16>}, {transform_indices = @transform_2, window_bounds = array<i64: 1, 1, 4, 16, 16>}, {transform_indices = @transform_3, window_bounds = array<i64: 1, 4, 8, 16>}]} {
    %c0 = arith.constant 0 : index
    %c0_0 = arith.constant 0 : index
    %c0_1 = arith.constant 0 : index
    %c0_2 = arith.constant 0 : index
    %c0_3 = arith.constant 0 : index
    %0 = vector.load %arg2[%c0, %c0_0, %c0_1, %c0_2, %c0_3] : memref<1x1x4x8x16xf32, #tpu.memory_space<vmem>>, vector<1x1x4x8x16xf32>
    %1 = vector.shape_cast %0 : vector<1x1x4x8x16xf32> to vector<4x8x16xf32>
    %c0_4 = arith.constant 0 : index
    %c0_5 = arith.constant 0 : index
    %c0_6 = arith.constant 0 : index
    %c0_7 = arith.constant 0 : index
    %c0_8 = arith.constant 0 : index
    %2 = vector.load %arg3[%c0_4, %c0_5, %c0_6, %c0_7, %c0_8] : memref<1x1x4x16x16xf32, #tpu.memory_space<vmem>>, vector<1x1x4x16x16xf32>
    %3 = vector.shape_cast %2 : vector<1x1x4x16x16xf32> to vector<4x16x16xf32>
    %c0_9 = arith.constant 0 : index
    %c0_10 = arith.constant 0 : index
    %c0_11 = arith.constant 0 : index
    %c0_12 = arith.constant 0 : index
    %c0_13 = arith.constant 0 : index
    %4 = vector.load %arg4[%c0_9, %c0_10, %c0_11, %c0_12, %c0_13] : memref<1x1x4x16x16xf32, #tpu.memory_space<vmem>>, vector<1x1x4x16x16xf32>
    %5 = vector.shape_cast %4 : vector<1x1x4x16x16xf32> to vector<4x16x16xf32>
    %cst = arith.constant 1.250000e-01 : f32
    %6 = vector.broadcast %cst : f32 to vector<4x8x16xf32>
    %7 = arith.mulf %1, %6 : vector<4x8x16xf32>
    %cst_14 = arith.constant dense<0.000000e+00> : vector<4x8x16xf32>
    %8 = tpu.matmul %7, %3, %cst_14 {dimension_numbers = #tpu.dot_dimension_numbers<[2], [2], [1], [1], [0, 0, 0, 1, 1, 1], [0], [0]>} : vector<4x8x16xf32>, vector<4x16x16xf32>, vector<4x8x16xf32> -> vector<4x8x16xf32>
    %cst_15 = arith.constant dense<0xFF800000> : vector<4x8xf32>
    %9 = vector.multi_reduction <maximumf>, %8, %cst_15 [2] : vector<4x8x16xf32> to vector<4x8xf32>
    %10 = vector.shape_cast %9 : vector<4x8xf32> to vector<4x8x1xf32>
    %11 = vector.broadcast %10 : vector<4x8x1xf32> to vector<4x8x16xf32>
    %12 = arith.subf %8, %11 : vector<4x8x16xf32>
    %13 = math.exp %12 : vector<4x8x16xf32>
    %cst_16 = arith.constant dense<0.000000e+00> : vector<4x8xf32>
    %14 = vector.multi_reduction <add>, %13, %cst_16 [2] : vector<4x8x16xf32> to vector<4x8xf32>
    %15 = vector.shape_cast %14 : vector<4x8xf32> to vector<4x8x1xf32>
    %cst_17 = arith.constant dense<0.000000e+00> : vector<4x8x16xf32>
    %16 = tpu.matmul %13, %5, %cst_17 {dimension_numbers = #tpu.dot_dimension_numbers<[2], [1], [1], [2], [0, 0, 0, 1, 1, 2], [0], [0]>} : vector<4x8x16xf32>, vector<4x16x16xf32>, vector<4x8x16xf32> -> vector<4x8x16xf32>
    %17 = tpu.reciprocal %15 {approx = true} : vector<4x8x1xf32> -> vector<4x8x1xf32>
    %18 = vector.broadcast %17 : vector<4x8x1xf32> to vector<4x8x16xf32>
    %19 = arith.mulf %16, %18 : vector<4x8x16xf32>
    %c0_18 = arith.constant 0 : index
    %c0_19 = arith.constant 0 : index
    %c0_20 = arith.constant 0 : index
    %c0_21 = arith.constant 0 : index
    %20 = vector.load %arg5[%c0_18, %c0_19, %c0_20, %c0_21] : memref<1x4x8x16xf32, #tpu.memory_space<vmem>>, vector<1x4x8x16xf32>
    %21 = vector.shape_cast %20 : vector<1x4x8x16xf32> to vector<4x8x16xf32>
    %22 = vector.shape_cast %19 : vector<4x8x16xf32> to vector<1x4x8x16xf32>
    tpu.vector_store %arg5[%c0_18, %c0_19, %c0_20, %c0_21], %22 {strides = array<i32>} : memref<1x4x8x16xf32, #tpu.memory_space<vmem>>, vector<1x4x8x16xf32>,
    return
  }
  func.func @transform_0(%arg0: i32, %arg1: i32) -> (i32, i32, i32, i32, i32) {
    %c0_i32 = arith.constant 0 : i32
    %c0_i32_0 = arith.constant 0 : i32
    %c0_i32_1 = arith.constant 0 : i32
    %c0_i32_2 = arith.constant 0 : i32
    return %arg0, %c0_i32, %arg1, %c0_i32_0, %c0_i32_1 : i32, i32, i32, i32, i32
  }
  func.func @transform_1(%arg0: i32, %arg1: i32) -> (i32, i32, i32, i32, i32) {
    %c1_i32 = arith.constant 1 : i32
    %c0_i32 = arith.constant 0 : i32
    %c0_i32_0 = arith.constant 0 : i32
    %c0_i32_1 = arith.constant 0 : i32
    return %arg0, %c1_i32, %arg1, %c0_i32, %c0_i32_0 : i32, i32, i32, i32, i32
  }
  func.func @transform_2(%arg0: i32, %arg1: i32) -> (i32, i32, i32, i32, i32) {
    %c2_i32 = arith.constant 2 : i32
    %c0_i32 = arith.constant 0 : i32
    %c0_i32_0 = arith.constant 0 : i32
    %c0_i32_1 = arith.constant 0 : i32
    return %arg0, %c2_i32, %arg1, %c0_i32, %c0_i32_0 : i32, i32, i32, i32, i32
  }
  func.func @transform_3(%arg0: i32, %arg1: i32) -> (i32, i32, i32, i32) {
    %c0_i32 = arith.constant 0 : i32
    %c0_i32_0 = arith.constant 0 : i32
    %c0_i32_1 = arith.constant 0 : i32
    return %arg0, %arg1, %c0_i32, %c0_i32_0 : i32, i32, i32, i32
  }
}

</mosaic_0001>

<bundles_post_ra>
// kernel: cross_attention_mp_forward.3
= control target key start
LH: loop header
LB: loop body
LE: loop exit
PB: predicated region body
PF: predicated region fallthrough
CT: control target
= control target key end

     0   :  { %s682_s9 = smov 0   ;;  %s684_s10 = smov 0   ;;  %s795_s0 = inlined_call_operand.vmem [shape: f32[2,8,256], index: 0, kind: input, shape index: {}]   ;;  %s796_s1 = inlined_call_operand.vmem [shape: f32[8,24], index: 1, kind: input, shape index: {}]   ;;  %s797_s2 = inlined_call_operand.vmem [shape: f32[2,256,24], index: 2, kind: output, shape index: {}]  }
   0x1   :  { %s686_s11 = smov 0   ;;  %s688_s12 = smov 0  }
   0x2   :  { %s690_s13 = smov 0  }
   0x3 LB: > { %s21_s14 = sadd.s32 1, %s657_s11  ;;  %s24_s15 = sadd.s32 1, %s661_s12  ;;  %s665_s13 = sphi %s690_s13, %s12_s13   ;;  %s661_s12 = sphi %s688_s12, %s801_s12   ;;  %s657_s11 = sphi %s686_s11, %s800_s11   ;;  %s653_s10 = sphi %s684_s10, %s799_s10   ;;  %s649_s9 = sphi %s682_s9, %s798_s9  }
   0x4   : > { %p22_p0 = scmp.ge.s32.totalorder %s21_s14, 2  ;;  %p517_p1 = scmp.ge.s32.totalorder %s665_s13, 1 }
   0x5   : > { %p131_p2 = scmp.lt.s32.totalorder %s665_s13, 5 }
   0x6   : > { %s803_s14 = smov (%p22_p0, %s21_s14), 0  ;;  %s805_s15 = smov (!%p22_p0, %s24_s15), %s661_s12 }
   0x7   : > { %p132_p3 = pnand %p517_p1, %p131_p2  ;;  %p26_p4 = scmp.ge.s32.totalorder %s805_s15, 2 }
   0x8   : > { %p160_p5 = scmp.lt.s32.totalorder (!%p132_p3), %s653_s10, 1  ;;  %p162_p6 = scmp.lt.s32.totalorder (!%p132_p3), %s649_s9, 1  ;;  %v179_v1 = vld [vmem:[%s796_s1] sm:$0xff] (!%p132_p3)  ;;  %vm212_vm0 = vcmask (!%p132_p3), 64512   ;;  %vm406_vm1 = vcmask (!%p132_p3), 195584  }
   0x9   : > { %s807_s15 = smov (%p26_p4, %s805_s15), 0  ;;  %135 = sbr.rel (%p132_p3) target bundleno = 426 (0x1aa), region = 28 }
   0xa   : > { %558 = vmatprep.subr.mxu0 (!%p132_p3), %v179_v1  ;;  %584 = vmatprep.subr.mxu1 (!%p132_p3), %v179_v1  ;;  %s520_s25 = sshll.u32 (!%p132_p3), %s649_s9, 4 }
   0xb   : > { %559 = vmatpush3.msra.mxu0 (!%p132_p3), %v179_v1  ;;  %585 = vmatpush3.msra.mxu1 (!%p132_p3), %v179_v1  ;;  %p171_p7 = scmp.lt.s32.totalorder (!%p132_p3), %s520_s25, 31 }
  0x10   : > { %s809_s10 = smov (!%p160_p5, %s653_s10), 1  ;;  %s811_s25 = smov (!%p171_p7, %s520_s25), 31 }
  0x11   : > { %s163_s16 = scalar_select %p162_p6, %s649_s9, 1 }
  0x12   : > { %s518_s17 = sshll.u32 %s809_s10, 1  ;;  %s521_s26 = sshll.u32 %s809_s10, 5 }
  0x13   : > { %s165_s18 = sadd.s32 %s518_s17, %s163_s16  ;;  %s174_s27 = sadd.s32 %s521_s26, %s811_s25 }
  0x14   : > { %s519_s19 = sshll.u32 %s165_s18, 3  ;;  %s522_s28 = sshll.u32 %s174_s27, 3 }
  0x15   : > { %s167_s22 = scalar_lea.vmem %s795_s0, %s519_s19  ;;  %s746_s3 = scalar_lea.vmem %s797_s2, %s522_s28 }
  0x16   : > { %v178_v0 = vld [vmem:[%s167_s22] sm:$0xff] }
  0x17   : > { %180 = vxpose.xlu0.b32.start.end [1/1] (short) %v178_v0, 128 }
  0x97   : > { %v196_v2 = vpop.trf.xlu0 }
  0x98   : > { %560 = vmatprep.mubr.msk.f32.mxu0 %vm212_vm0, %v196_v2 }
  0x9b   : > { %v197_v3 = vpop.trf.xlu0 }
  0x9c   : > { %561 = vmatmul.mubr.msk.f32.vlgmr.msra.gmra.mrb[0].mxu0 %vm212_vm0, %v197_v3 }
  0x9f   : > { %v198_v4 = vpop.trf.xlu0 }
  0xa0   : > { %563 = vmatprep.mubr.msk.f32.mxu0 %vm212_vm0, %v198_v4 }
  0xa3   : > { %v199_v5 = vpop.trf.xlu0 }
  0xa4   : > { %564 = vmatmul.mubr.msk.f32.gmra.mrb[2].mxu0 %vm212_vm0, %v199_v5 }
  0xa7   : > { %v200_v6 = vpop.trf.xlu0 }
  0xa8   : > { %566 = vmatprep.mubr.msk.f32.mxu0 %vm212_vm0, %v200_v6 }
  0xab   : > { %v201_v7 = vpop.trf.xlu0 }
  0xac   : > { %567 = vmatmul.mubr.msk.f32.gmra.mrb[4].mxu0 %vm212_vm0, %v201_v7 }
  0xaf   : > { %v202_v8 = vpop.trf.xlu0 }
  0xb0   : > { %569 = vmatprep.mubr.msk.f32.mxu0 %vm212_vm0, %v202_v8 }
  0xb3   : > { %v203_v9 = vpop.trf.xlu0 }
  0xb4   : > { %570 = vmatmul.mubr.msk.f32.gmra.mrb[6].mxu0 %vm212_vm0, %v203_v9 }
  0xb7   : > { %v204_v10 = vpop.trf.xlu0 }
  0xb8   : > { %572 = vmatprep.mubr.msk.f32.mxu1 %vm212_vm0, %v204_v10 }
  0xbb   : > { %v205_v11 = vpop.trf.xlu0 }
  0xbc   : > { %573 = vmatmul.mubr.msk.f32.vlgmr.msra.gmra.mrb[0].mxu1 %vm212_vm0, %v205_v11 }
  0xbf   : > { %v206_v12 = vpop.trf.xlu0 }
  0xc0   : > { %575 = vmatprep.mubr.msk.f32.mxu1 %vm212_vm0, %v206_v12 }
  0xc3   : > { %v207_v13 = vpop.trf.xlu0 }
  0xc4   : > { %576 = vmatmul.mubr.msk.f32.gmra.mrb[2].mxu1 %vm212_vm0, %v207_v13 }
  0xc7   : > { %v208_v14 = vpop.trf.xlu0 }
  0xc8   : > { %578 = vmatprep.mubr.msk.f32.mxu1 %vm212_vm0, %v208_v14 }
  0xcb   : > { %v209_v15 = vpop.trf.xlu0 }
  0xcc   : > { %579 = vmatmul.mubr.msk.f32.gmra.mrb[4].mxu1 %vm212_vm0, %v209_v15 }
  0xcf   : > { %v210_v16 = vpop.trf.xlu0 }
  0xd0   : > { %581 = vmatprep.mubr.msk.f32.mxu1 %vm212_vm0, %v210_v16 }
  0xd3   : > { %v211_v17 = vpop.trf.xlu0 }
  0xd4   : > { %582 = vmatmul.mubr.msk.f32.gmra.mrb[6].mxu1 %vm212_vm0, %v211_v17 }
 0x16f   : > { %v562_v18 = vpop.f32.mrb[0].mxu0 }
 0x170   : > { %408 = vst.msk [vmem:[%s746_s3 + $0x8] sm:$0xff] %vm406_vm1, %v562_v18  ;;  %v327_v19 = vpop.f32.mrb[1].mxu0 }
 0x171   : > { %407 = vst.msk [vmem:[%s746_s3] sm:$0xff] %vm406_vm1, %v327_v19 }
 0x177   : > { %v565_v20 = vpop.f32.mrb[2].mxu0 }
 0x178   : > { %410 = vst.msk [vmem:[%s746_s3 + $0x18] sm:$0xff] %vm406_vm1, %v565_v20  ;;  %v337_v21 = vpop.f32.mrb[3].mxu0 }
 0x179   : > { %409 = vst.msk [vmem:[%s746_s3 + $0x10] sm:$0xff] %vm406_vm1, %v337_v21 }
 0x17f   : > { %v568_v22 = vpop.f32.mrb[4].mxu0 }
 0x180   : > { %412 = vst.msk [vmem:[%s746_s3 + $0x28] sm:$0xff] %vm406_vm1, %v568_v22  ;;  %v347_v23 = vpop.f32.mrb[5].mxu0 }
 0x181   : > { %411 = vst.msk [vmem:[%s746_s3 + $0x20] sm:$0xff] %vm406_vm1, %v347_v23 }
 0x187   : > { %v571_v24 = vpop.f32.mrb[6].mxu0 }
 0x188   : > { %414 = vst.msk [vmem:[%s746_s3 + $0x38] sm:$0xff] %vm406_vm1, %v571_v24  ;;  %v357_v25 = vpop.f32.mrb[7].mxu0 }
 0x189   : > { %413 = vst.msk [vmem:[%s746_s3 + $0x30] sm:$0xff] %vm406_vm1, %v357_v25 }
 0x18f   : > { %v574_v26 = vpop.f32.mrb[0].mxu1 }
 0x190   : > { %416 = vst.msk [vmem:[%s746_s3 + $0x48] sm:$0xff] %vm406_vm1, %v574_v26  ;;  %v367_v27 = vpop.f32.mrb[1].mxu1 }
 0x191   : > { %415 = vst.msk [vmem:[%s746_s3 + $0x40] sm:$0xff] %vm406_vm1, %v367_v27 }
 0x197   : > { %v577_v28 = vpop.f32.mrb[2].mxu1 }
 0x198   : > { %418 = vst.msk [vmem:[%s746_s3 + $0x58] sm:$0xff] %vm406_vm1, %v577_v28  ;;  %v377_v29 = vpop.f32.mrb[3].mxu1 }
 0x199   : > { %417 = vst.msk [vmem:[%s746_s3 + $0x50] sm:$0xff] %vm406_vm1, %v377_v29 }
 0x19f   : > { %v580_v30 = vpop.f32.mrb[4].mxu1 }
 0x1a0   : > { %420 = vst.msk [vmem:[%s746_s3 + $0x68] sm:$0xff] %vm406_vm1, %v580_v30  ;;  %v387_v31 = vpop.f32.mrb[5].mxu1 }
 0x1a1   : > { %419 = vst.msk [vmem:[%s746_s3 + $0x60] sm:$0xff] %vm406_vm1, %v387_v31 }
 0x1a7   : > { %v583_v32 = vpop.f32.mrb[6].mxu1 }
 0x1a8   : > { %422 = vst.msk [vmem:[%s746_s3 + $0x78] sm:$0xff] %vm406_vm1, %v583_v32  ;;  %v397_v33 = vpop.f32.mrb[7].mxu1 }
 0x1a9   : > { %421 = vst.msk [vmem:[%s746_s3 + $0x70] sm:$0xff] %vm406_vm1, %v397_v33 }
 0x1aa PF: > { %s12_s13 = sadd.s32 1, %s665_s13   ;;  %s798_s9 = smov %s657_s11 }
 0x1ab   : > { %p9_p8 = scmp.ge.s32.totalorder %s12_s13, 6   ;;  %s799_s10 = smov %s661_s12 }
 0x1ac   : > { %s800_s11 = smov %s803_s14  ;;  %s801_s12 = smov %s807_s15 }
 0x1ad   :  { %11 = sbr.rel (!%p9_p8) target bundleno = 3 (0x3), region = 58 }

// kernel: cross_attention_mp_forward.4
= control target key start
LH: loop header
LB: loop body
LE: loop exit
PB: predicated region body
PF: predicated region fallthrough
CT: control target
= control target key end

     0   :  { %s640_s9 = smov 0   ;;  %s642_s10 = smov 0   ;;  %s730_s0 = inlined_call_operand.vmem [shape: f32[2,8,128], index: 0, kind: input, shape index: {}]   ;;  %s731_s1 = inlined_call_operand.vmem [shape: f32[8,24], index: 1, kind: input, shape index: {}]   ;;  %s732_s2 = inlined_call_operand.vmem [shape: f32[2,128,24], index: 2, kind: output, shape index: {}]  }
   0x1   :  { %s644_s11 = smov 0  }
   0x2 LB: > { %s24_s12 = sadd.s32 1, %s619_s10  ;;  %p508_p0 = scmp.ge.s32.totalorder %s623_s11, 1  ;;  %s623_s11 = sphi %s644_s11, %s12_s11   ;;  %s619_s10 = sphi %s642_s10, %s734_s10   ;;  %s615_s9 = sphi %s640_s9, %s733_s9  }
   0x3   : > { %p26_p1 = scmp.ge.s32.totalorder %s24_s12, 2  ;;  %p130_p2 = scmp.lt.s32.totalorder %s623_s11, 3 }
   0x5   : > { %s736_s12 = smov (%p26_p1, %s24_s12), 0  ;;  %p131_p3 = pnand %p508_p0, %p130_p2 }
   0x6   : > { %p158_p4 = scmp.lt.s32.totalorder (!%p131_p3), %s615_s9, 1  ;;  %v176_v1 = vld [vmem:[%s731_s1] sm:$0xff] (!%p131_p3)  ;;  %vm209_vm0 = vcmask (!%p131_p3), 64512   ;;  %vm403_vm1 = vcmask (!%p131_p3), 195584  }
   0x7   : > { %134 = sbr.rel (%p131_p3) target bundleno = 421 (0x1a5), region = 28  ;;  %548 = vmatprep.subr.mxu0 (!%p131_p3), %v176_v1  ;;  %574 = vmatprep.subr.mxu1 (!%p131_p3), %v176_v1 }
   0x8   : > { %549 = vmatpush3.msra.mxu0 (!%p131_p3), %v176_v1  ;;  %575 = vmatpush3.msra.mxu1 (!%p131_p3), %v176_v1 }
   0xe   : > { %s738_s9 = smov (!%p158_p4, %s615_s9), 1 }
   0xf   : > { %s509_s13 = sshll.u32 %s738_s9, 3  ;;  %s530_s19 = sshll.u32 %s738_s9, 7 }
  0x10   : > { %s164_s16 = scalar_lea.vmem %s730_s0, %s509_s13  ;;  %s687_s22 = scalar_lea.vmem %s732_s2, %s530_s19 }
  0x11   : > { %v175_v0 = vld [vmem:[%s164_s16] sm:$0xff] }
  0x12   : > { %177 = vxpose.xlu0.b32.start.end [1/1] (short) %v175_v0, 128 }
  0x92   : > { %v193_v2 = vpop.trf.xlu0 }
  0x93   : > { %550 = vmatprep.mubr.msk.f32.mxu0 %vm209_vm0, %v193_v2 }
  0x96   : > { %v194_v3 = vpop.trf.xlu0 }
  0x97   : > { %551 = vmatmul.mubr.msk.f32.vlgmr.msra.gmra.mrb[0].mxu0 %vm209_vm0, %v194_v3 }
  0x9a   : > { %v195_v4 = vpop.trf.xlu0 }
  0x9b   : > { %553 = vmatprep.mubr.msk.f32.mxu0 %vm209_vm0, %v195_v4 }
  0x9e   : > { %v196_v5 = vpop.trf.xlu0 }
  0x9f   : > { %554 = vmatmul.mubr.msk.f32.gmra.mrb[2].mxu0 %vm209_vm0, %v196_v5 }
  0xa2   : > { %v197_v6 = vpop.trf.xlu0 }
  0xa3   : > { %556 = vmatprep.mubr.msk.f32.mxu0 %vm209_vm0, %v197_v6 }
  0xa6   : > { %v198_v7 = vpop.trf.xlu0 }
  0xa7   : > { %557 = vmatmul.mubr.msk.f32.gmra.mrb[4].mxu0 %vm209_vm0, %v198_v7 }
  0xaa   : > { %v199_v8 = vpop.trf.xlu0 }
  0xab   : > { %559 = vmatprep.mubr.msk.f32.mxu0 %vm209_vm0, %v199_v8 }
  0xae   : > { %v200_v9 = vpop.trf.xlu0 }
  0xaf   : > { %560 = vmatmul.mubr.msk.f32.gmra.mrb[6].mxu0 %vm209_vm0, %v200_v9 }
  0xb2   : > { %v201_v10 = vpop.trf.xlu0 }
  0xb3   : > { %562 = vmatprep.mubr.msk.f32.mxu1 %vm209_vm0, %v201_v10 }
  0xb6   : > { %v202_v11 = vpop.trf.xlu0 }
  0xb7   : > { %563 = vmatmul.mubr.msk.f32.vlgmr.msra.gmra.mrb[0].mxu1 %vm209_vm0, %v202_v11 }
  0xba   : > { %v203_v12 = vpop.trf.xlu0 }
  0xbb   : > { %565 = vmatprep.mubr.msk.f32.mxu1 %vm209_vm0, %v203_v12 }
  0xbe   : > { %v204_v13 = vpop.trf.xlu0 }
  0xbf   : > { %566 = vmatmul.mubr.msk.f32.gmra.mrb[2].mxu1 %vm209_vm0, %v204_v13 }
  0xc2   : > { %v205_v14 = vpop.trf.xlu0 }
  0xc3   : > { %568 = vmatprep.mubr.msk.f32.mxu1 %vm209_vm0, %v205_v14 }
  0xc6   : > { %v206_v15 = vpop.trf.xlu0 }
  0xc7   : > { %569 = vmatmul.mubr.msk.f32.gmra.mrb[4].mxu1 %vm209_vm0, %v206_v15 }
  0xca   : > { %v207_v16 = vpop.trf.xlu0 }
  0xcb   : > { %571 = vmatprep.mubr.msk.f32.mxu1 %vm209_vm0, %v207_v16 }
  0xce   : > { %v208_v17 = vpop.trf.xlu0 }
  0xcf   : > { %572 = vmatmul.mubr.msk.f32.gmra.mrb[6].mxu1 %vm209_vm0, %v208_v17 }
 0x16a   : > { %v552_v18 = vpop.f32.mrb[0].mxu0 }
 0x16b   : > { %405 = vst.msk [vmem:[%s687_s22 + $0x8] sm:$0xff] %vm403_vm1, %v552_v18  ;;  %v324_v19 = vpop.f32.mrb[1].mxu0 }
 0x16c   : > { %404 = vst.msk [vmem:[%s687_s22] sm:$0xff] %vm403_vm1, %v324_v19 }
 0x172   : > { %v555_v20 = vpop.f32.mrb[2].mxu0 }
 0x173   : > { %407 = vst.msk [vmem:[%s687_s22 + $0x18] sm:$0xff] %vm403_vm1, %v555_v20  ;;  %v334_v21 = vpop.f32.mrb[3].mxu0 }
 0x174   : > { %406 = vst.msk [vmem:[%s687_s22 + $0x10] sm:$0xff] %vm403_vm1, %v334_v21 }
 0x17a   : > { %v558_v22 = vpop.f32.mrb[4].mxu0 }
 0x17b   : > { %409 = vst.msk [vmem:[%s687_s22 + $0x28] sm:$0xff] %vm403_vm1, %v558_v22  ;;  %v344_v23 = vpop.f32.mrb[5].mxu0 }
 0x17c   : > { %408 = vst.msk [vmem:[%s687_s22 + $0x20] sm:$0xff] %vm403_vm1, %v344_v23 }
 0x182   : > { %v561_v24 = vpop.f32.mrb[6].mxu0 }
 0x183   : > { %411 = vst.msk [vmem:[%s687_s22 + $0x38] sm:$0xff] %vm403_vm1, %v561_v24  ;;  %v354_v25 = vpop.f32.mrb[7].mxu0 }
 0x184   : > { %410 = vst.msk [vmem:[%s687_s22 + $0x30] sm:$0xff] %vm403_vm1, %v354_v25 }
 0x18a   : > { %v564_v26 = vpop.f32.mrb[0].mxu1 }
 0x18b   : > { %413 = vst.msk [vmem:[%s687_s22 + $0x48] sm:$0xff] %vm403_vm1, %v564_v26  ;;  %v364_v27 = vpop.f32.mrb[1].mxu1 }
 0x18c   : > { %412 = vst.msk [vmem:[%s687_s22 + $0x40] sm:$0xff] %vm403_vm1, %v364_v27 }
 0x192   : > { %v567_v28 = vpop.f32.mrb[2].mxu1 }
 0x193   : > { %415 = vst.msk [vmem:[%s687_s22 + $0x58] sm:$0xff] %vm403_vm1, %v567_v28  ;;  %v374_v29 = vpop.f32.mrb[3].mxu1 }
 0x194   : > { %414 = vst.msk [vmem:[%s687_s22 + $0x50] sm:$0xff] %vm403_vm1, %v374_v29 }
 0x19a   : > { %v570_v30 = vpop.f32.mrb[4].mxu1 }
 0x19b   : > { %417 = vst.msk [vmem:[%s687_s22 + $0x68] sm:$0xff] %vm403_vm1, %v570_v30  ;;  %v384_v31 = vpop.f32.mrb[5].mxu1 }
 0x19c   : > { %416 = vst.msk [vmem:[%s687_s22 + $0x60] sm:$0xff] %vm403_vm1, %v384_v31 }
 0x1a2   : > { %v573_v32 = vpop.f32.mrb[6].mxu1 }
 0x1a3   : > { %419 = vst.msk [vmem:[%s687_s22 + $0x78] sm:$0xff] %vm403_vm1, %v573_v32  ;;  %v394_v33 = vpop.f32.mrb[7].mxu1 }
 0x1a4   : > { %418 = vst.msk [vmem:[%s687_s22 + $0x70] sm:$0xff] %vm403_vm1, %v394_v33 }
 0x1a5 PF: > { %s12_s11 = sadd.s32 1, %s623_s11   ;;  %s733_s9 = smov %s619_s10 }
 0x1a6   : > { %p9_p5 = scmp.ge.s32.totalorder %s12_s11, 4   ;;  %s734_s10 = smov %s736_s12 }
 0x1a8   :  { %11 = sbr.rel (!%p9_p5) target bundleno = 2 (0x2), region = 58 }

// kernel: cross_attention_mp_forward.5
= control target key start
LH: loop header
LB: loop body
LE: loop exit
PB: predicated region body
PF: predicated region fallthrough
CT: control target
= control target key end

     0   :  { %8 = vsyncpa [#allocation3], 0  ;;  %s1704_s0 = inlined_call_operand.vmem [shape: f32[2,3,8,8,16], index: 0, kind: input, shape index: {}]   ;;  %s1705_s1 = inlined_call_operand.vmem [shape: f32[2,3,8,16,16], index: 1, kind: input, shape index: {}, may-alias: {1,2}]   ;;  %s1706_s2 = inlined_call_operand.vmem [shape: f32[2,3,8,16,16], index: 2, kind: input, shape index: {}, may-alias: {1,2}]   ;;  %s1707_s3 = inlined_call_operand.hbm [shape: f32[2,8,8,16], index: 3, kind: output, shape index: {}]  }
   0x1   :  { %10 = vsyncpa [#allocation3 + $0x1], 0  ;;  %s1486_s12 = smov 0   ;;  %s1488_s13 = smov 0  }
   0x2   :  { %s1490_s14 = smov 0   ;;  %s1492_s15 = smov 0  }
   0x3   :  { %s1494_s16 = smov 0   ;;  %s1496_s17 = smov 0  }
   0x4   :  { %s1498_s18 = smov 0   ;;  %s1500_s19 = smov 0  }
   0x5 LB: > { %s1111_s20 = sadd.s32 4294967295, %s1458_s19   ;;  %s1112_s21 = sadd.s32 4294967294, %s1458_s19   ;;  %s1458_s19 = sphi %s1500_s19, %s16_s19   ;;  %s1454_s18 = sphi %s1498_s18, %s1718_s18   ;;  %s1450_s17 = sphi %s1496_s17, %s1717_s17   ;;  %s1446_s16 = sphi %s1494_s16, %s1716_s16   ;;  %s1442_s15 = sphi %s1492_s15, %s1715_s15   ;;  %s1438_s14 = sphi %s1490_s14, %s1714_s14   ;;  %s1434_s13 = sphi %s1488_s13, %s1713_s13   ;;  %s1430_s12 = sphi %s1486_s12, %s1712_s12  }
   0x6   : > { %s25_s22 = sadd.s32 1, %s1450_s17  ;;  %s28_s23 = sadd.s32 1, %s1454_s18 }
   0x7   : > { %p26_p0 = scmp.ge.s32.totalorder %s25_s22, 2  ;;  %p131_p1 = scmp.ne.s32.totalorder %s1438_s14, %s1434_s13 }
   0x8   : > { %p132_p2 = scmp.eq.s32.totalorder %s1111_s20, 3  ;;  %p137_p5 = scmp.ne.s32.totalorder %s1434_s13, %s1430_s12 }
   0x9   : > { %s1720_s22 = smov (%p26_p0, %s25_s22), 0  ;;  %s1722_s23 = smov (!%p26_p0, %s28_s23), %s1454_s18 }
   0xa   : > { %s117_s24 = ssub.s32 %s1450_s17, %s1720_s22  ;;  %p1537_p3 = por %p132_p2, %p131_p1 }
   0xb   : > { %p30_p4 = scmp.ge.s32.totalorder %s1722_s23, 2  ;;  %p138_p6 = scmp.eq.s32.totalorder %s1112_s21, 3 }
   0xc   : > { %p1115_p7 = scmp.ge.s32.totalorder %s1458_s19, 1  ;;  %p199_p9 = scmp.lt.s32.totalorder %s1458_s19, 5 }
   0xd   : > { %s1724_s23 = smov (%p30_p4, %s1722_s23), 0  ;;  %p1546_p8 = por %p138_p6, %p137_p5 }
   0xe   : > { %s116_s27 = ssub.s32 %s1454_s18, %s1724_s23  ;;  %s121_s28 = sadd.s32 1, %s1438_s14 }
   0xf   : > { %s118_s29 = sor.u32 %s117_s24, %s116_s27  ;;  %p200_p10 = pnand %p1115_p7, %p199_p9 }
  0x10   : > { %p119_p11 = scmp.eq.s32.totalorder %s118_s29, 0  ;;  %s1558_s4 = sshll.u32 (!%p200_p10), %s1442_s15, 2  ;;  %v1460_v0 = vmov (!%p200_p10), 0.0|0.0   ;;  %vm1461_vm0 = vmmov (!%p200_p10), 0   ;;  %v1462_v1 = vmov (!%p200_p10), 0.0   ;;  %vm308_vm1 = vcmask (!%p200_p10), 130048  }
  0x11   : > { %203 = sbr.rel (%p200_p10) target bundleno = 652 (0x28c), region = 32  ;;  %p250_p12 = scmp.lt.s32.totalorder (!%p200_p10), %s1446_s16, 1  ;;  %1243 = vmatprep.subr.bf16.mxu0 (!%p200_p10), %v1460_v0  ;;  %1247 = vmatprep.subr.bf16.mxu1 (!%p200_p10), %v1460_v0  ;;  %vm1580_vm2 = vmpackc.low (!%p200_p10), %vm308_vm1, %vm308_vm1 }
  0x12   : > { %s1555_s30 = scalar_select %p119_p11, %s1438_s14, %s121_s28  }
  0x13   : > { %p252_p13 = scmp.lt.s32.totalorder (!%p200_p10), %s1558_s4, 7  ;;  %1191 = vmatprep.mubr.msk.f32.mxu0 (!%p200_p10), %vm1461_vm0, %v1462_v1  ;;  %1198 = vmatprep.mubr.msk.f32.mxu1 (!%p200_p10), %vm1461_vm0, %v1462_v1 }
  0x18   : > { %s251_s5 = scalar_select %p250_p12, %s1446_s16, 1 }
  0x19   : > { %s253_s6 = scalar_select %p252_p13, %s1558_s4, 7 }
  0x1a   : > { %s1045_s7 = smul.u32 48, %s251_s5 }
  0x1b   : > { %s1120_s8 = sshll.u32 %s253_s6, 1  ;;  %s1271_s9 = smul.u32 24, %s251_s5 }
  0x1c   : > { %s1570_s10 = sadd.s32 %s1120_s8, %s1045_s7 }
  0x1d   : > { %s1121_s11 = sshll.u32 %s1570_s10, 3  ;;  %s255_s15 = sadd.s32 %s1271_s9, %s253_s6 }
  0x1e   : > { %s1048_s24 = scalar_lea.vmem %s1705_s1, %s1121_s11  ;;  %s1118_s27 = sshll.u32 %s255_s15, 3 }
  0x1f   : > { %v1125_v3 = vld [vmem:[%s1048_s24 + $0x80] sm:$0xff]  ;;  %v1126_v4 = vld [vmem:[%s1048_s24 + $0x88] sm:$0xff]  ;;  %v1127_v5 = vld [vmem:[%s1048_s24 + $0x90] sm:$0xff]  ;;  %s257_s5 = scalar_lea.vmem %s1704_s0, %s1118_s27  ;;  %s1054_s8 = scalar_lea.vmem %s1706_s2, %s1121_s11 }
  0x20   : > { %v1244_v6 = vpack.c.bf16 %v1126_v4, %v1125_v3  ;;  %v1128_v7 = vld [vmem:[%s1048_s24 + $0x98] sm:$0xff]  ;;  %v284_v9 = vld [vmem:[%s257_s5] sm:$0xff]  ;;  %v1130_v11 = vld [vmem:[%s1048_s24 + $0xa8] sm:$0xff]  ;;  %s246_s9 = sand.u32 1, %s1434_s13   ;;  %s1159_s15 = sshll.u32 %s1446_s16, 3 }
  0x21   : > { %v1248_v8 = vpack.c.bf16 %v1128_v7, %v1127_v5  ;;  %v1129_v10 = vld [vmem:[%s1048_s24 + $0xa0] sm:$0xff]  ;;  %v285_v12 = vld [vmem:[%s257_s5 + $0x8] sm:$0xff]  ;;  %v1131_v13 = vld [vmem:[%s1048_s24 + $0xb0] sm:$0xff]  ;;  %v304_v15 = vmul.f32 0.125, %v284_v9  ;;  %s1116_s10 = sshll.u32 %s246_s9, 5  ;;  %s978_s20 = sadd.s32 %s1159_s15, %s1558_s4 }
  0x22   : > { %1246 = vmatpush3.bf16.xpose.msk.msra.mxu0 %vm1580_vm2, %v1244_v6  ;;  %v1132_v14 = vld [vmem:[%s1048_s24 + $0xb8] sm:$0xff]  ;;  %v1252_v16 = vpack.c.bf16 %v1130_v11, %v1129_v10  ;;  %v305_v17 = vmul.f32 0.125, %v285_v12  ;;  %v286_v19 = vld [vmem:[%s257_s5 + $0x10] sm:$0xff]  ;;  %v1133_v35 = vld [vmem:[%s1054_s8 + $0x100] sm:$0xff]  ;;  %s248_s11 = scalar_lea.vmem [#allocation2], %s1116_s10  ;;  %s1160_s24 = sshll.u32 %s978_s20, 7 }
  0x23   : > { %1250 = vmatpush3.bf16.xpose.msk.msra.mxu1 %vm1580_vm2, %v1248_v8  ;;  %1251 = vmatprep.subr.bf16.mxu0 %v1460_v0  ;;  %v1256_v18 = vpack.c.bf16 %v1132_v14, %v1131_v13  ;;  %v287_v20 = vld [vmem:[%s257_s5 + $0x18] sm:$0xff]  ;;  %v306_v21 = vmul.f32 0.125, %v286_v19  ;;  %v1134_v36 = vld [vmem:[%s1054_s8 + $0x108] sm:$0xff]  ;;  %v1135_v38 = vld [vmem:[%s1054_s8 + $0x110] sm:$0xff]  ;;  %s981_s21 = sshll.u32 %s248_s11, 4  ;;  %s1647_s27 = scalar_lea.hbm %s1707_s3, %s1160_s24  ;;  %s1642_s21 = int_to_ptr.vmem [resolvable:$true] %s981_s21 }
  0x24   : > { %1255 = vmatprep.subr.bf16.mxu1 %v1460_v0  ;;  %v307_v22 = vmul.f32 0.125, %v287_v20  ;;  %v1260_v37 = vpack.c.bf16 %v1134_v36, %v1133_v35  ;;  %v1136_v39 = vld [vmem:[%s1054_s8 + $0x118] sm:$0xff]  ;;  %v1137_v49 = vld [vmem:[%s1054_s8 + $0x120] sm:$0xff]  ;;  %v1138_v50 = vld [vmem:[%s1054_s8 + $0x128] sm:$0xff]  ;;  %s1652_s28 = scalar_lea.sflag [#allocation3], %s246_s9  ;;  %s1364_s29 = scalar_lea.vmem %s1642_s21, 512 }
  0x25   : > { %v1263_v40 = vpack.c.bf16 %v1136_v39, %v1135_v38  ;;  %v1266_v54 = vpack.c.bf16 %v1138_v50, %v1137_v49  ;;  %v1139_v55 = vld [vmem:[%s1054_s8 + $0x130] sm:$0xff]  ;;  %v1140_v56 = vld [vmem:[%s1054_s8 + $0x138] sm:$0xff]  ;;  %p1365_p0 = scmp.ne.s32.totalorder %s1642_s21, %s1364_s29  ;;  %s1463_s5 = smov [#allocation2]  }
  0x26   : > { %v1269_v60 = vpack.c.bf16 %v1140_v56, %v1139_v55  ;;  %s1368_s6 = sshll.u32 %s1463_s5, 4  ;;  %s1369_s6 = int_to_ptr.vmem [resolvable:$false] %s1368_s6 }
  0x27   : > { %p1366_p1 = pnand %p1365_p0, %p1537_p3  ;;  %s1370_s7 = scalar_lea.vmem %s1369_s6, 1024 }
  0x28   : > { %p1371_p4 = scmp.lt.s32.totalorder %s1642_s21, %s1369_s6  ;;  %p1372_p5 = scmp.lt.s32.totalorder %s1370_s7, %s1364_s29 }
  0x29   : > { %1192 = vmatmul.mubr.msk.f32.vlgmr.msra.gmra.mrb[0].mxu0 %vm308_vm1, %v304_v15  ;;  %p1367_p2 = pneg %p1366_p1 }
  0x2a   : > { %1254 = vmatpush3.bf16.xpose.msk.msra.mxu0 %vm1580_vm2, %v1252_v16  ;;  %1199 = vmatmul.mubr.msk.f32.vlgmr.msra.gmra.mrb[0].mxu1 %vm308_vm1, %v305_v17  ;;  %p1373_p6 = por %p1372_p5, %p1371_p4 }
  0x2b   : > { %1258 = vmatpush3.bf16.xpose.msk.msra.mxu1 %vm1580_vm2, %v1256_v18  ;;  %1205 = vmatprep.mubr.msk.f32.mxu0 %vm1461_vm0, %v1462_v1 }
  0x2c   : > { %1212 = vmatprep.mubr.msk.f32.mxu1 %vm1461_vm0, %v1462_v1  ;;  %1259 = vmatprep.subr.bf16.mxu0 %v1460_v0  ;;  %p1374_p7 = pnand %p1373_p6, %p1367_p2 }
  0x2d   : > { %1262 = vmatprep.subr.bf16.mxu1 %v1460_v0 }
  0x31   : > { %1206 = vmatmul.mubr.msk.f32.vlgmr.msra.gmra.mrb[2].mxu0 %vm308_vm1, %v306_v21 }
  0x32   : > { %1213 = vmatmul.mubr.msk.f32.vlgmr.msra.gmra.mrb[2].mxu1 %vm308_vm1, %v307_v22  ;;  %1219 = vmatprep.mubr.msk.f32.mxu0 %vm1461_vm0, %v1462_v1 }
  0x33   : > { %1226 = vmatprep.mubr.msk.f32.mxu1 %vm1461_vm0, %v1462_v1  ;;  %1261 = vmatpush3.bf16.msra.mxu0 %v1260_v37 }
  0x34   : > { %1265 = vmatprep.subr.bf16.mxu0 %v1460_v0  ;;  %1264 = vmatpush3.bf16.msra.mxu1 %v1263_v40 }
  0x35   : > { %1268 = vmatprep.subr.bf16.mxu1 %v1460_v0 }
  0xfc   : > { %v384_v23 = vpop.f32.mrb[0].mxu0 }
  0xfd   : > { %v1193_v24 = vpop.f32.mrb[1].mxu0  ;;  %v625_v25 = vsel %vm308_vm1, %v384_v23, -inf  ;;  %v463_v26 = vpop.f32.mrb[0].mxu1 }
  0xfe   : > { %626 = vmax.xlane.f32.xlu0 %v625_v25  ;;  %v1200_v27 = vpop.f32.mrb[1].mxu1  ;;  %v628_v28 = vsel %vm308_vm1, %v463_v26, -inf }
 0x102   : > { %629 = vmax.xlane.f32.xlu0 %v628_v28 }
 0x104   : > { %v542_v29 = vpop.f32.mrb[2].mxu0 }
 0x105   : > { %v1207_v30 = vpop.f32.mrb[3].mxu0  ;;  %v631_v31 = vsel %vm308_vm1, %v542_v29, -inf  ;;  %v621_v32 = vpop.f32.mrb[2].mxu1 }
 0x106   : > { %632 = vmax.xlane.f32.xlu1 %v631_v31  ;;  %v1214_v33 = vpop.f32.mrb[3].mxu1  ;;  %v634_v34 = vsel %vm308_vm1, %v621_v32, -inf }
 0x10a   : > { %635 = vmax.xlane.f32.xlu1 %v634_v34 }
 0x18b   : > { %v627_v41 = vpop.xlane.xlu0 %626 }
 0x18c   : > { %v637_v42 = vsub.f32 %v384_v23, %v627_v41 }
 0x18e   : > { %v641_v43 = vmul.f32 1.442695, %v637_v42 }
 0x18f   : > { %v630_v44 = vpop.xlane.xlu0 %629 }
 0x190   : > { %1348 = vpow2.f32 %v641_v43  ;;  %v638_v45 = vsub.f32 %v463_v26, %v630_v44 }
 0x192   : > { %v643_v46 = vmul.f32 1.442695, %v638_v45 }
 0x193   : > { %v633_v47 = vpop.xlane.xlu1 %632 }
 0x194   : > { %1350 = vpow2.f32 %v643_v46  ;;  %v639_v48 = vsub.f32 %v542_v29, %v633_v47 }
 0x196   : > { %v645_v51 = vmul.f32 1.442695, %v639_v48 }
 0x197   : > { %v636_v52 = vpop.xlane.xlu1 %635 }
 0x198   : > { %1352 = vpow2.f32 %v645_v51  ;;  %v640_v53 = vsub.f32 %v621_v32, %v636_v52 }
 0x19a   : > { %v1349_v57 = vpop.eup %1348  ;;  %v647_v58 = vmul.f32 1.442695, %v640_v53 }
 0x19b   : > { %1220 = vmatmul.mubr.msk.f32.vlgmr.msra.gmra.mrb[4].mxu0 %vm308_vm1, %v1349_v57  ;;  %v649_v59 = vsel %vm308_vm1, %v1349_v57, 0.0 }
 0x19c   : > { %1354 = vpow2.f32 %v647_v58  ;;  %650 = vadd.xlane.f32.xlu0 %v649_v59  ;;  %1267 = vmatpush3.bf16.msra.mxu0 %v1266_v54 }
 0x19d   : > { %1233 = vmatprep.mubr.msk.f32.mxu0 %vm1461_vm0, %v1462_v1 }
 0x19e   : > { %v1351_v61 = vpop.eup %1350 }
 0x19f   : > { %1227 = vmatmul.mubr.msk.f32.vlgmr.msra.gmra.mrb[4].mxu1 %vm308_vm1, %v1351_v61  ;;  %v652_v62 = vsel %vm308_vm1, %v1351_v61, 0.0 }
 0x1a0   : > { %653 = vadd.xlane.f32.xlu1 %v652_v62  ;;  %1270 = vmatpush3.bf16.msra.mxu1 %v1269_v60 }
 0x1a1   : > { %1240 = vmatprep.mubr.msk.f32.mxu1 %vm1461_vm0, %v1462_v1 }
 0x1a2   : > { %v1353_v63 = vpop.eup %1352 }
 0x1a3   : > { %1234 = vmatmul.mubr.msk.f32.vlgmr.msra.gmra.mrb[6].mxu0 %vm308_vm1, %v1353_v63  ;;  %v655_v0 = vsel %vm308_vm1, %v1353_v63, 0.0 }
 0x1a4   : > { %656 = vadd.xlane.f32.xlu0 %v655_v0 }
 0x1a6   : > { %v1355_v2 = vpop.eup %1354 }
 0x1a7   : > { %1241 = vmatmul.mubr.msk.f32.vlgmr.msra.gmra.mrb[6].mxu1 %vm308_vm1, %v1355_v2  ;;  %v658_v3 = vsel %vm308_vm1, %v1355_v2, 0.0 }
 0x1a8   : > { %659 = vadd.xlane.f32.xlu1 %v658_v3 }
 0x229   : > { %v651_v4 = vpop.xlane.xlu0 %650 }
 0x22a   : > { %1356 = vrcp.f32 %v651_v4 }
 0x22d   : > { %v654_v5 = vpop.xlane.xlu1 %653 }
 0x22e   : > { %1358 = vrcp.f32 %v654_v5 }
 0x231   : > { %v657_v6 = vpop.xlane.xlu0 %656 }
 0x232   : > { %1360 = vrcp.f32 %v657_v6 }
 0x234   : > { %v1357_v7 = vpop.eup %1356 }
 0x235   : > { %v660_v1 = vpop.xlane.xlu1 %659 }
 0x236   : > { %1362 = vrcp.f32 %v660_v1 }
 0x238   : > { %v1359_v11 = vpop.eup %1358 }
 0x23c   : > { %v1361_v15 = vpop.eup %1360 }
 0x240   : > { %v1363_v19 = vpop.eup %1362 }
 0x26e   : > { %v730_v8 = vpop.f32.mrb[4].mxu0 }
 0x26f   : > { %v957_v9 = vmul.f32 %v1357_v7, %v730_v8  ;;  %v1221_v10 = vpop.f32.mrb[5].mxu0 }
 0x271   : > { %961 = vst.msk [vmem:[%s248_s11] sm:$0xff] %vm308_vm1, %v957_v9 }
 0x272   : > { %v803_v12 = vpop.f32.mrb[4].mxu1 }
 0x273   : > { %v958_v13 = vmul.f32 %v1359_v11, %v803_v12  ;;  %v1228_v14 = vpop.f32.mrb[5].mxu1 }
 0x275   : > { %962 = vst.msk [vmem:[%s248_s11 + $0x8] sm:$0xff] %vm308_vm1, %v958_v13 }
 0x276   : > { %v876_v16 = vpop.f32.mrb[6].mxu0 }
 0x277   : > { %v959_v17 = vmul.f32 %v1361_v15, %v876_v16  ;;  %v1235_v18 = vpop.f32.mrb[7].mxu0 }
 0x279   : > { %963 = vst.msk [vmem:[%s248_s11 + $0x10] sm:$0xff] %vm308_vm1, %v959_v17 }
 0x27a   : > { %v949_v20 = vpop.f32.mrb[6].mxu1 }
 0x27b   : > { %v960_v21 = vmul.f32 %v1363_v19, %v949_v20  ;;  %v1242_v22 = vpop.f32.mrb[7].mxu1 }
 0x27d   : > { %964 = vst.msk [vmem:[%s248_s11 + $0x18] sm:$0xff] %vm308_vm1, %v960_v21 }
 0x27e   : > { %1377 = shalt.err (!%p1374_p7)
}
 0x27f   : > { %s1378_s8 = scalar_lea.hbm %s1647_s27, 512  ;;  %s1382_s11 = scalar_lea.hbm %s1707_s3, 2048 }
 0x280   : > { %p1379_p9 = scmp.ne.s32.totalorder %s1647_s27, %s1378_s8  ;;  %p1383_p12 = scmp.lt.u32.totalorder %s1647_s27, %s1707_s3 }
 0x281   : > { %p1384_p13 = scmp.lt.u32.totalorder %s1382_s11, %s1378_s8  ;;  %p1386_p1 = scmp.lt.u32.totalorder %s1378_s8, %s1647_s27 }
 0x282   : > { %p1380_p10 = pnand %p1379_p9, %p1537_p3 }
 0x283   : > { %p1385_p0 = por %p1384_p13, %p1383_p12 }
 0x284   : > { %p1381_p11 = pneg %p1380_p10 }
 0x285   : > { %p1387_p2 = por %p1386_p1, %p1385_p0 }
 0x287   : > { %p1388_p4 = pnand %p1387_p2, %p1381_p11 }
 0x289   : > { %1391 = shalt.err (!%p1388_p4)
}
 0x28a   : > { %s1464_s24 = smov 128   ;;  %s1465_s16 = smov 8  }
 0x28b   : > { %1272 = dma.vmem_to_hbm [thread:$0]  (%p1537_p3), %s1642_s21, 512, %s1647_s27, %s1652_s28, %s1464_s24, %s1464_s24, %s1465_s16  }
 0x28c PF: > { %p1278_p5 = scmp.ge.s32.totalorder %s1458_s19, 2  ;;  %s996_s4 = sand.u32 1, %s1430_s12  }
 0x28d   : > { %s997_s29 = scalar_lea.sflag [#allocation3], %s996_s4 }
 0x28e   : > { %p1275_p6 = pnand %p1278_p5, %p1546_p8 }
 0x290   : > { %1425 = dma.done.wait (!%p1275_p6), %s997_s29, 512  }
 0x291   : > { %1427 = vsyncadd (!%p1275_p6), %s997_s29, 4294966784  ;;  %s16_s19 = sadd.s32 1, %s1458_s19   ;;  %s1712_s12 = smov %s1434_s13 }
 0x292   : > { %p13_p7 = scmp.ge.s32.totalorder %s16_s19, 6   ;;  %s1713_s13 = smov %s1438_s14 }
 0x293   : > { %s1714_s14 = smov %s1555_s30  ;;  %s1715_s15 = smov %s1450_s17 }
 0x294   : > { %s1716_s16 = smov %s1454_s18  ;;  %s1717_s17 = smov %s1720_s22 }
 0x295   : > { %s1718_s18 = smov %s1724_s23  ;;  %15 = sbr.rel (!%p13_p7) target bundleno = 5 (0x5), region = 73 }
 0x29c   :  { %1002 = vsyncpa [#allocation3], 1 }
 0x29d   :  { %1004 = vsyncpa [#allocation3 + $0x1], 1 }

</bundles_post_ra>
